<compile_context>
chip_gen: v7x
topology: tpu7x:2x2x1
jax: 0.10.0
libtpu: 0.0.40
codegen_flags: <defaults>
</compile_context>

<pallas_src>
import functools

import jax
import jax.numpy as jnp
from jax import lax
from jax.experimental import pallas as pl
from jax.experimental.pallas import tpu as pltpu


def _infonce_kernel(inv_temp_ref, img_ref, txt_ref, loss_ref,
                    m_row, l_row, m_col, l_col, acc_ref,
                    *, use_bf16_matmul, batch_size):
    i = pl.program_id(0)          # row-tile index (outer)
    j = pl.program_id(1)          # column-tile index (inner)
    ni = pl.num_programs(0)
    nj = pl.num_programs(1)

    inv_temp = inv_temp_ref[0, 0]

    # ---------------- init accumulators ----------------
    @pl.when(jnp.logical_and(i == 0, j == 0))
    def _():
        acc_ref[...] = jnp.zeros_like(acc_ref)

    @pl.when(j == 0)
    def _():
        m_row[...] = jnp.full_like(m_row, -jnp.inf)
        l_row[...] = jnp.zeros_like(l_row)

    @pl.when(i == 0)
    def _():
        m_col[j] = jnp.full(m_col.shape[1:], -jnp.inf, jnp.float32)
        l_col[j] = jnp.zeros(l_col.shape[1:], jnp.float32)

    # ---------------- normalize tiles (f32); fold 1/temperature into the LHS ----------
    img = img_ref[...].astype(jnp.float32)
    txt = txt_ref[...].astype(jnp.float32)
    img_n = img * lax.rsqrt(jnp.sum(img * img, axis=-1, keepdims=True))
    txt_n = txt * lax.rsqrt(jnp.sum(txt * txt, axis=-1, keepdims=True))
    img_s = img_n * inv_temp

    if use_bf16_matmul:
        lhs = img_s.astype(jnp.bfloat16)
        rhs = txt_n.astype(jnp.bfloat16)
    else:
        lhs = img_s
        rhs = txt_n

    # sim tile = (img_n / temperature) @ txt_n.T  -> (tm, tn), f32 accumulate on MXU.
    sim = lax.dot_general(lhs, rhs, (((1,), (1,)), ((), ())),
                          preferred_element_type=jnp.float32)

    # ---------------- online row log-sum-exp ----------------
    row_max = jnp.max(sim, axis=1, keepdims=True)                       # (tm, 1)
    new_m_row = jnp.maximum(m_row[...], row_max)
    p_row = jnp.exp(sim - new_m_row)
    l_row[...] = (l_row[...] * jnp.exp(m_row[...] - new_m_row)
                  + jnp.sum(p_row, axis=1, keepdims=True))
    m_row[...] = new_m_row

    # ---------------- online column log-sum-exp ----------------
    col_max = jnp.max(sim, axis=0, keepdims=True)                       # (1, tn)
    old_m = m_col[j]
    old_l = l_col[j]
    new_m_col = jnp.maximum(old_m, col_max)
    p_col = jnp.exp(sim - new_m_col)
    col_sum = jnp.sum(p_col, axis=0, keepdims=True)                     # (1, tn)
    l_col[j] = old_l * jnp.exp(old_m - new_m_col) + col_sum
    m_col[j] = new_m_col

    # ---------------- trace(sim): diagonal tiles only (tm == tn, aligned rows) --------
    @pl.when(i == j)
    def _():
        diag = jnp.sum(img_s * txt_n, keepdims=True)                    # (1, 1)
        acc_ref[...] = acc_ref[...] - 2.0 * diag

    # ---------------- finalize this row tile after the last column tile ---------------
    @pl.when(j == nj - 1)
    def _():
        acc_ref[...] = acc_ref[...] + jnp.sum(m_row[...] + jnp.log(l_row[...]),
                                              keepdims=True)

    # ---------------- finalize this column tile after the last row tile ---------------
    @pl.when(i == ni - 1)
    def _():
        acc_ref[...] = acc_ref[...] + jnp.sum(m_col[j] + jnp.log(l_col[j]),
                                              keepdims=True)

    # ---------------- final scalar loss ----------------
    @pl.when(jnp.logical_and(i == ni - 1, j == nj - 1))
    def _():
        loss_ref[...] = acc_ref[...] * jnp.float32(1.0 / batch_size)


def _pick_tile(n, block_rows):
    """Largest tile <= block_rows that divides n and is a multiple of 8 (else n)."""
    if n <= block_rows:
        return n
    t = (min(block_rows, n) // 8) * 8
    while t >= 8:
        if n % t == 0:
            return t
        t -= 8
    return n


def infonce_loss(image_embeddings, text_embeddings, temperature=1.0,
                 *, block_rows=256, use_bf16_matmul=True):
    """Pallas TPU implementation of InfoNCELoss.forward. Returns a scalar f32."""
    n, d = image_embeddings.shape
    assert text_embeddings.shape == (n, d)

    tm = _pick_tile(n, block_rows)
    tn = tm
    num_i = n // tm
    num_j = n // tn

    inv_temp = jnp.full((1, 1), 1.0 / float(temperature), dtype=jnp.float32)

    kernel = functools.partial(_infonce_kernel,
                               use_bf16_matmul=use_bf16_matmul,
                               batch_size=n)

    itemsize = jnp.dtype(image_embeddings.dtype).itemsize
    cost = pl.CostEstimate(flops=2 * n * n * d + 4 * n * n + 6 * n * d,
                           transcendentals=2 * n * n + 4 * n,
                           bytes_accessed=2 * n * d * itemsize + 4)

    op_bytes = 2 if use_bf16_matmul else 4
    vmem_bytes = (2 * 2 * tm * d * itemsize        # double-buffered input tiles
                  + 2 * tm * d * (4 + op_bytes)    # normalized f32 + matmul operands
                  + 4 * num_j * tn * 4             # column-LSE scratch (all tiles)
                  + 6 * tm * tn * 4                # sim / p_row / p_col temporaries
                  + (2 << 20))
    vmem_limit = int(min(max(vmem_bytes, 32 * 1024 * 1024), 64 * 1024 * 1024))

    # NOTE: both grid axes carry cross-iteration state (column-LSE scratch across the
    # outer axis, the loss accumulator across both), so both stay "arbitrary".
    # TODO(synk): a 2-core split (v7x) would need per-core column-LSE partials plus a
    # combine step; omitted to keep a single fused pass over sim.
    out = pl.pallas_call(
        kernel,
        out_shape=jax.ShapeDtypeStruct((1, 1), jnp.float32),
        grid=(num_i, num_j),
        in_specs=[
            pl.BlockSpec(memory_space=pltpu.MemorySpace.SMEM),     # 1/temperature
            pl.BlockSpec((tm, d), lambda i, j: (i, 0)),            # image tile
            pl.BlockSpec((tn, d), lambda i, j: (j, 0)),            # text tile
        ],
        out_specs=pl.BlockSpec((1, 1), lambda i, j: (0, 0)),
        scratch_shapes=[
            pltpu.VMEM((tm, 1), jnp.float32),          # m_row (running row max)
            pltpu.VMEM((tm, 1), jnp.float32),          # l_row (running row sum-exp)
            pltpu.VMEM((num_j, 1, tn), jnp.float32),   # m_col (running col max, per tile)
            pltpu.VMEM((num_j, 1, tn), jnp.float32),   # l_col (running col sum-exp)
            pltpu.VMEM((1, 1), jnp.float32),           # scalar loss accumulator
        ],
        compiler_params=pltpu.CompilerParams(
            dimension_semantics=("arbitrary", "arbitrary"),
            vmem_limit_bytes=vmem_limit,
        ),
        cost_estimate=cost,
    )(inv_temp, image_embeddings, text_embeddings)
    return out[0, 0]


def _infonce_ref(image_embeddings, text_embeddings, temperature=1.0):
    """Pure-JAX reference matching the PyTorch module."""
    img = image_embeddings.astype(jnp.float32)
    txt = text_embeddings.astype(jnp.float32)
    img_n = img / jnp.linalg.norm(img, axis=-1, keepdims=True)
    txt_n = txt / jnp.linalg.norm(txt, axis=-1, keepdims=True)
    sim = img_n @ txt_n.T / temperature
    n = sim.shape[0]
    x0 = -jnp.log(jax.nn.softmax(sim, axis=0))
    x1 = -jnp.log(jax.nn.softmax(sim, axis=1))
    return jnp.trace(x0) / n + jnp.trace(x1) / n


if __name__ == "__main__":
    # Small shapes consistent with the module; chosen to exercise a real 2x2 tile grid.
    N, D = 32, 64
    temperature = 0.5
    key = jax.random.PRNGKey(0)
    k_img, k_txt = jax.random.split(key)
    image_embeddings = jax.random.normal(k_img, (N, D), dtype=jnp.float32)
    text_embeddings = jax.random.normal(k_txt, (N, D), dtype=jnp.float32)

    ref = _infonce_ref(image_embeddings, text_embeddings, temperature)

    # Full-f32 path (tight check of the tiled online-LSE algorithm).
    loss_f32 = infonce_loss(image_embeddings, text_embeddings, temperature,
                            block_rows=16, use_bf16_matmul=False)
    jax.block_until_ready(loss_f32)
    assert jnp.allclose(loss_f32, ref, rtol=2e-3, atol=2e-3), (loss_f32, ref)

    # Production default: bf16 MXU inputs, f32 accumulate (looser tolerance).
    loss_bf16 = infonce_loss(image_embeddings, text_embeddings, temperature,
                             block_rows=16, use_bf16_matmul=True)
    jax.block_until_ready(loss_bf16)
    assert jnp.allclose(loss_bf16, ref, rtol=5e-2, atol=5e-2), (loss_bf16, ref)

    print("KERNEL_OK")
</pallas_src>

<mosaic_0001>
module attributes {stable_mosaic.version = 11 : i64} {
  func.func @_infonce_kernel(%arg0: i32, %arg1: i32, %arg2: memref<1x1xf32, #tpu.memory_space<smem>>, %arg3: memref<16x64xf32, #tpu.memory_space<vmem>>, %arg4: memref<16x64xf32, #tpu.memory_space<vmem>>, %arg5: memref<1x1xf32, #tpu.memory_space<vmem>>, %arg6: memref<16x1xf32, #tpu.memory_space<vmem>>, %arg7: memref<16x1xf32, #tpu.memory_space<vmem>>, %arg8: memref<2x1x16xf32, #tpu.memory_space<vmem>>, %arg9: memref<2x1x16xf32, #tpu.memory_space<vmem>>, %arg10: memref<1x1xf32, #tpu.memory_space<vmem>>) attributes {dimension_semantics = [#tpu.dimension_semantics<arbitrary>, #tpu.dimension_semantics<arbitrary>], iteration_bounds = array<i64: 2, 2>, scalar_prefetch = 0 : i64, scratch_operands = 5 : i64, tpu.core_type = #tpu.core_type<tc>, window_params = [{transform_indices = @transform_0, window_bounds = array<i64: 1, 1>}, {transform_indices = @transform_1, window_bounds = array<i64: 16, 64>}, {transform_indices = @transform_2, window_bounds = array<i64: 16, 64>}, {pipeline_mode = #tpu.pipeline_mode<synchronous>, transform_indices = @transform_3, window_bounds = array<i64: 1, 1>}]} {
    %c0 = arith.constant 0 : index
    %c0_0 = arith.constant 0 : index
    %0 = memref.load %arg2[%c0, %c0_0] : memref<1x1xf32, #tpu.memory_space<smem>>
    %c0_i32 = arith.constant 0 : i32
    %1 = arith.cmpi eq, %arg0, %c0_i32 : i32
    %c0_i32_1 = arith.constant 0 : i32
    %2 = arith.cmpi eq, %arg1, %c0_i32_1 : i32
    %3 = arith.andi %1, %2 : i1
    %4 = arith.extui %3 : i1 to i32
    %c0_i32_2 = arith.constant 0 : i32
    %5 = arith.cmpi ne, %4, %c0_i32_2 : i32
    scf.if %5 {
      %cst_42 = arith.constant 0.000000e+00 : f32
      %86 = vector.broadcast %cst_42 : f32 to vector<1x1xf32>
      %c0_43 = arith.constant 0 : index
      %c0_44 = arith.constant 0 : index
      %87 = vector.load %arg10[%c0_43, %c0_44] : memref<1x1xf32, #tpu.memory_space<vmem>>, vector<1x1xf32>
      tpu.vector_store %arg10[%c0_43, %c0_44], %86 {strides = array<i32>} : memref<1x1xf32, #tpu.memory_space<vmem>>, vector<1x1xf32>,
    } else {
    }
    %c0_i32_3 = arith.constant 0 : i32
    %6 = arith.cmpi eq, %arg1, %c0_i32_3 : i32
    %7 = arith.extui %6 : i1 to i32
    %c0_i32_4 = arith.constant 0 : i32
    %8 = arith.cmpi ne, %7, %c0_i32_4 : i32
    scf.if %8 {
      %cst_42 = arith.constant 0xFF800000 : f32
      %86 = vector.broadcast %cst_42 : f32 to vector<16x1xf32>
      %c0_43 = arith.constant 0 : index
      %c0_44 = arith.constant 0 : index
      %87 = vector.load %arg6[%c0_43, %c0_44] : memref<16x1xf32, #tpu.memory_space<vmem>>, vector<16x1xf32>
      tpu.vector_store %arg6[%c0_43, %c0_44], %86 {strides = array<i32>} : memref<16x1xf32, #tpu.memory_space<vmem>>, vector<16x1xf32>,
      %cst_45 = arith.constant 0.000000e+00 : f32
      %88 = vector.broadcast %cst_45 : f32 to vector<16x1xf32>
      %c0_46 = arith.constant 0 : index
      %c0_47 = arith.constant 0 : index
      %89 = vector.load %arg7[%c0_46, %c0_47] : memref<16x1xf32, #tpu.memory_space<vmem>>, vector<16x1xf32>
      tpu.vector_store %arg7[%c0_46, %c0_47], %88 {strides = array<i32>} : memref<16x1xf32, #tpu.memory_space<vmem>>, vector<16x1xf32>,
    } else {
    }
    %c0_i32_5 = arith.constant 0 : i32
    %9 = arith.cmpi eq, %arg0, %c0_i32_5 : i32
    %10 = arith.extui %9 : i1 to i32
    %c0_i32_6 = arith.constant 0 : i32
    %11 = arith.cmpi ne, %10, %c0_i32_6 : i32
    scf.if %11 {
      %cst_42 = arith.constant 0xFF800000 : f32
      %86 = vector.broadcast %cst_42 : f32 to vector<1x16xf32>
      %87 = arith.index_cast %arg1 : i32 to index
      %c0_43 = arith.constant 0 : index
      %c0_44 = arith.constant 0 : index
      %88 = vector.load %arg8[%87, %c0_43, %c0_44] : memref<2x1x16xf32, #tpu.memory_space<vmem>>, vector<1x1x16xf32>
      %89 = vector.shape_cast %88 : vector<1x1x16xf32> to vector<1x16xf32>
      %90 = vector.shape_cast %86 : vector<1x16xf32> to vector<1x1x16xf32>
      tpu.vector_store %arg8[%87, %c0_43, %c0_44], %90 {strides = array<i32>} : memref<2x1x16xf32, #tpu.memory_space<vmem>>, vector<1x1x16xf32>,
      %cst_45 = arith.constant 0.000000e+00 : f32
      %91 = vector.broadcast %cst_45 : f32 to vector<1x16xf32>
      %92 = arith.index_cast %arg1 : i32 to index
      %c0_46 = arith.constant 0 : index
      %c0_47 = arith.constant 0 : index
      %93 = vector.load %arg9[%92, %c0_46, %c0_47] : memref<2x1x16xf32, #tpu.memory_space<vmem>>, vector<1x1x16xf32>
      %94 = vector.shape_cast %93 : vector<1x1x16xf32> to vector<1x16xf32>
      %95 = vector.shape_cast %91 : vector<1x16xf32> to vector<1x1x16xf32>
      tpu.vector_store %arg9[%92, %c0_46, %c0_47], %95 {strides = array<i32>} : memref<2x1x16xf32, #tpu.memory_space<vmem>>, vector<1x1x16xf32>,
    } else {
    }
    %c0_7 = arith.constant 0 : index
    %c0_8 = arith.constant 0 : index
    %12 = vector.load %arg3[%c0_7, %c0_8] : memref<16x64xf32, #tpu.memory_space<vmem>>, vector<16x64xf32>
    %c0_9 = arith.constant 0 : index
    %c0_10 = arith.constant 0 : index
    %13 = vector.load %arg4[%c0_9, %c0_10] : memref<16x64xf32, #tpu.memory_space<vmem>>, vector<16x64xf32>
    %14 = arith.mulf %12, %12 : vector<16x64xf32>
    %cst = arith.constant dense<0.000000e+00> : vector<16xf32>
    %15 = vector.multi_reduction <add>, %14, %cst [1] : vector<16x64xf32> to vector<16xf32>
    %16 = vector.shape_cast %15 : vector<16xf32> to vector<16x1xf32>
    %17 = math.rsqrt %16 : vector<16x1xf32>
    %18 = vector.broadcast %17 : vector<16x1xf32> to vector<16x64xf32>
    %19 = arith.mulf %12, %18 : vector<16x64xf32>
    %20 = arith.mulf %13, %13 : vector<16x64xf32>
    %cst_11 = arith.constant dense<0.000000e+00> : vector<16xf32>
    %21 = vector.multi_reduction <add>, %20, %cst_11 [1] : vector<16x64xf32> to vector<16xf32>
    %22 = vector.shape_cast %21 : vector<16xf32> to vector<16x1xf32>
    %23 = math.rsqrt %22 : vector<16x1xf32>
    %24 = vector.broadcast %23 : vector<16x1xf32> to vector<16x64xf32>
    %25 = arith.mulf %13, %24 : vector<16x64xf32>
    %26 = vector.broadcast %0 : f32 to vector<16x64xf32>
    %27 = arith.mulf %19, %26 : vector<16x64xf32>
    %cst_12 = arith.constant dense<0.000000e+00> : vector<16x16xf32>
    %28 = tpu.matmul %27, %25, %cst_12 {dimension_numbers = #tpu.dot_dimension_numbers<[1], [1], [0], [0], [0, 0, 1, 0], [], []>} : vector<16x64xf32>, vector<16x64xf32>, vector<16x16xf32> -> vector<16x16xf32>
    %cst_13 = arith.constant dense<0xFF800000> : vector<16xf32>
    %29 = vector.multi_reduction <maximumf>, %28, %cst_13 [1] : vector<16x16xf32> to vector<16xf32>
    %30 = vector.shape_cast %29 : vector<16xf32> to vector<16x1xf32>
    %c0_14 = arith.constant 0 : index
    %c0_15 = arith.constant 0 : index
    %31 = vector.load %arg6[%c0_14, %c0_15] : memref<16x1xf32, #tpu.memory_space<vmem>>, vector<16x1xf32>
    %32 = arith.maximumf %31, %30 : vector<16x1xf32>
    %33 = vector.broadcast %32 : vector<16x1xf32> to vector<16x16xf32>
    %34 = arith.subf %28, %33 : vector<16x16xf32>
    %35 = math.exp %34 : vector<16x16xf32>
    %c0_16 = arith.constant 0 : index
    %c0_17 = arith.constant 0 : index
    %36 = vector.load %arg7[%c0_16, %c0_17] : memref<16x1xf32, #tpu.memory_space<vmem>>, vector<16x1xf32>
    %c0_18 = arith.constant 0 : index
    %c0_19 = arith.constant 0 : index
    %37 = vector.load %arg6[%c0_18, %c0_19] : memref<16x1xf32, #tpu.memory_space<vmem>>, vector<16x1xf32>
    %38 = arith.subf %37, %32 : vector<16x1xf32>
    %39 = math.exp %38 : vector<16x1xf32>
    %40 = arith.mulf %36, %39 : vector<16x1xf32>
    %cst_20 = arith.constant dense<0.000000e+00> : vector<16xf32>
    %41 = vector.multi_reduction <add>, %35, %cst_20 [1] : vector<16x16xf32> to vector<16xf32>
    %42 = vector.shape_cast %41 : vector<16xf32> to vector<16x1xf32>
    %43 = arith.addf %40, %42 : vector<16x1xf32>
    %c0_21 = arith.constant 0 : index
    %c0_22 = arith.constant 0 : index
    %44 = vector.load %arg7[%c0_21, %c0_22] : memref<16x1xf32, #tpu.memory_space<vmem>>, vector<16x1xf32>
    tpu.vector_store %arg7[%c0_21, %c0_22], %43 {strides = array<i32>} : memref<16x1xf32, #tpu.memory_space<vmem>>, vector<16x1xf32>,
    %c0_23 = arith.constant 0 : index
    %c0_24 = arith.constant 0 : index
    %45 = vector.load %arg6[%c0_23, %c0_24] : memref<16x1xf32, #tpu.memory_space<vmem>>, vector<16x1xf32>
    tpu.vector_store %arg6[%c0_23, %c0_24], %32 {strides = array<i32>} : memref<16x1xf32, #tpu.memory_space<vmem>>, vector<16x1xf32>,
    %cst_25 = arith.constant dense<0xFF800000> : vector<16xf32>
    %46 = vector.multi_reduction <maximumf>, %28, %cst_25 [0] : vector<16x16xf32> to vector<16xf32>
    %47 = vector.shape_cast %46 : vector<16xf32> to vector<1x16xf32>
    %48 = arith.index_cast %arg1 : i32 to index
    %c0_26 = arith.constant 0 : index
    %c0_27 = arith.constant 0 : index
    %49 = vector.load %arg8[%48, %c0_26, %c0_27] : memref<2x1x16xf32, #tpu.memory_space<vmem>>, vector<1x1x16xf32>
    %50 = vector.shape_cast %49 : vector<1x1x16xf32> to vector<1x16xf32>
    %51 = arith.index_cast %arg1 : i32 to index
    %c0_28 = arith.constant 0 : index
    %c0_29 = arith.constant 0 : index
    %52 = vector.load %arg9[%51, %c0_28, %c0_29] : memref<2x1x16xf32, #tpu.memory_space<vmem>>, vector<1x1x16xf32>
    %53 = vector.shape_cast %52 : vector<1x1x16xf32> to vector<1x16xf32>
    %54 = arith.maximumf %50, %47 : vector<1x16xf32>
    %55 = vector.broadcast %54 : vector<1x16xf32> to vector<16x16xf32>
    %56 = arith.subf %28, %55 : vector<16x16xf32>
    %57 = math.exp %56 : vector<16x16xf32>
    %cst_30 = arith.constant dense<0.000000e+00> : vector<16xf32>
    %58 = vector.multi_reduction <add>, %57, %cst_30 [0] : vector<16x16xf32> to vector<16xf32>
    %59 = vector.shape_cast %58 : vector<16xf32> to vector<1x16xf32>
    %60 = arith.subf %50, %54 : vector<1x16xf32>
    %61 = math.exp %60 : vector<1x16xf32>
    %62 = arith.mulf %53, %61 : vector<1x16xf32>
    %63 = arith.addf %62, %59 : vector<1x16xf32>
    %64 = arith.index_cast %arg1 : i32 to index
    %c0_31 = arith.constant 0 : index
    %c0_32 = arith.constant 0 : index
    %65 = vector.load %arg9[%64, %c0_31, %c0_32] : memref<2x1x16xf32, #tpu.memory_space<vmem>>, vector<1x1x16xf32>
    %66 = vector.shape_cast %65 : vector<1x1x16xf32> to vector<1x16xf32>
    %67 = vector.shape_cast %63 : vector<1x16xf32> to vector<1x1x16xf32>
    tpu.vector_store %arg9[%64, %c0_31, %c0_32], %67 {strides = array<i32>} : memref<2x1x16xf32, #tpu.memory_space<vmem>>, vector<1x1x16xf32>,
    %68 = arith.index_cast %arg1 : i32 to index
    %c0_33 = arith.constant 0 : index
    %c0_34 = arith.constant 0 : index
    %69 = vector.load %arg8[%68, %c0_33, %c0_34] : memref<2x1x16xf32, #tpu.memory_space<vmem>>, vector<1x1x16xf32>
    %70 = vector.shape_cast %69 : vector<1x1x16xf32> to vector<1x16xf32>
    %71 = vector.shape_cast %54 : vector<1x16xf32> to vector<1x1x16xf32>
    tpu.vector_store %arg8[%68, %c0_33, %c0_34], %71 {strides = array<i32>} : memref<2x1x16xf32, #tpu.memory_space<vmem>>, vector<1x1x16xf32>,
    %72 = arith.cmpi eq, %arg0, %arg1 : i32
    %73 = arith.extui %72 : i1 to i32
    %c0_i32_35 = arith.constant 0 : i32
    %74 = arith.cmpi ne, %73, %c0_i32_35 : i32
    scf.if %74 {
      %86 = arith.mulf %27, %25 : vector<16x64xf32>
      %87 = vector.shape_cast %86 : vector<16x64xf32> to vector<1x16x64xf32>
      %cst_42 = arith.constant dense<0.000000e+00> : vector<1xf32>
      %88 = vector.multi_reduction <add>, %87, %cst_42 [1, 2] : vector<1x16x64xf32> to vector<1xf32>
      %89 = vector.shape_cast %88 : vector<1xf32> to vector<1x1x1xf32>
      %90 = vector.extract %89[0, 0, 0] : f32 from vector<1x1x1xf32>
      %91 = vector.broadcast %90 : f32 to vector<1x1xf32>
      %c0_43 = arith.constant 0 : index
      %c0_44 = arith.constant 0 : index
      %92 = vector.load %arg10[%c0_43, %c0_44] : memref<1x1xf32, #tpu.memory_space<vmem>>, vector<1x1xf32>
      %cst_45 = arith.constant 2.000000e+00 : f32
      %93 = vector.broadcast %cst_45 : f32 to vector<1x1xf32>
      %94 = arith.mulf %93, %91 : vector<1x1xf32>
      %95 = arith.subf %92, %94 : vector<1x1xf32>
      %c0_46 = arith.constant 0 : index
      %c0_47 = arith.constant 0 : index
      %96 = vector.load %arg10[%c0_46, %c0_47] : memref<1x1xf32, #tpu.memory_space<vmem>>, vector<1x1xf32>
      tpu.vector_store %arg10[%c0_46, %c0_47], %95 {strides = array<i32>} : memref<1x1xf32, #tpu.memory_space<vmem>>, vector<1x1xf32>,
    } else {
    }
    %c1_i32 = arith.constant 1 : i32
    %75 = arith.cmpi eq, %arg1, %c1_i32 : i32
    %76 = arith.extui %75 : i1 to i32
    %c0_i32_36 = arith.constant 0 : i32
    %77 = arith.cmpi ne, %76, %c0_i32_36 : i32
    scf.if %77 {
      %c0_42 = arith.constant 0 : index
      %c0_43 = arith.constant 0 : index
      %86 = vector.load %arg10[%c0_42, %c0_43] : memref<1x1xf32, #tpu.memory_space<vmem>>, vector<1x1xf32>
      %c0_44 = arith.constant 0 : index
      %c0_45 = arith.constant 0 : index
      %87 = vector.load %arg6[%c0_44, %c0_45] : memref<16x1xf32, #tpu.memory_space<vmem>>, vector<16x1xf32>
      %c0_46 = arith.constant 0 : index
      %c0_47 = arith.constant 0 : index
      %88 = vector.load %arg7[%c0_46, %c0_47] : memref<16x1xf32, #tpu.memory_space<vmem>>, vector<16x1xf32>
      %89 = math.log %88 : vector<16x1xf32>
      %90 = arith.addf %87, %89 : vector<16x1xf32>
      %91 = vector.shape_cast %90 : vector<16x1xf32> to vector<1x16x1xf32>
      %cst_48 = arith.constant dense<0.000000e+00> : vector<1xf32>
      %92 = vector.multi_reduction <add>, %91, %cst_48 [1, 2] : vector<1x16x1xf32> to vector<1xf32>
      %93 = vector.shape_cast %92 : vector<1xf32> to vector<1x1x1xf32>
      %94 = vector.extract %93[0, 0, 0] : f32 from vector<1x1x1xf32>
      %95 = vector.broadcast %94 : f32 to vector<1x1xf32>
      %96 = arith.addf %86, %95 : vector<1x1xf32>
      %c0_49 = arith.constant 0 : index
      %c0_50 = arith.constant 0 : index
      %97 = vector.load %arg10[%c0_49, %c0_50] : memref<1x1xf32, #tpu.memory_space<vmem>>, vector<1x1xf32>
      tpu.vector_store %arg10[%c0_49, %c0_50], %96 {strides = array<i32>} : memref<1x1xf32, #tpu.memory_space<vmem>>, vector<1x1xf32>,
    } else {
    }
    %c1_i32_37 = arith.constant 1 : i32
    %78 = arith.cmpi eq, %arg0, %c1_i32_37 : i32
    %79 = arith.extui %78 : i1 to i32
    %c0_i32_38 = arith.constant 0 : i32
    %80 = arith.cmpi ne, %79, %c0_i32_38 : i32
    scf.if %80 {
      %c0_42 = arith.constant 0 : index
      %c0_43 = arith.constant 0 : index
      %86 = vector.load %arg10[%c0_42, %c0_43] : memref<1x1xf32, #tpu.memory_space<vmem>>, vector<1x1xf32>
      %87 = arith.index_cast %arg1 : i32 to index
      %c0_44 = arith.constant 0 : index
      %c0_45 = arith.constant 0 : index
      %88 = vector.load %arg8[%87, %c0_44, %c0_45] : memref<2x1x16xf32, #tpu.memory_space<vmem>>, vector<1x1x16xf32>
      %89 = vector.shape_cast %88 : vector<1x1x16xf32> to vector<1x16xf32>
      %90 = arith.index_cast %arg1 : i32 to index
      %c0_46 = arith.constant 0 : index
      %c0_47 = arith.constant 0 : index
      %91 = vector.load %arg9[%90, %c0_46, %c0_47] : memref<2x1x16xf32, #tpu.memory_space<vmem>>, vector<1x1x16xf32>
      %92 = vector.shape_cast %91 : vector<1x1x16xf32> to vector<1x16xf32>
      %93 = math.log %92 : vector<1x16xf32>
      %94 = arith.addf %89, %93 : vector<1x16xf32>
      %95 = vector.shape_cast %94 : vector<1x16xf32> to vector<1x1x16xf32>
      %cst_48 = arith.constant dense<0.000000e+00> : vector<1xf32>
      %96 = vector.multi_reduction <add>, %95, %cst_48 [1, 2] : vector<1x1x16xf32> to vector<1xf32>
      %97 = vector.shape_cast %96 : vector<1xf32> to vector<1x1x1xf32>
      %98 = vector.extract %97[0, 0, 0] : f32 from vector<1x1x1xf32>
      %99 = vector.broadcast %98 : f32 to vector<1x1xf32>
      %100 = arith.addf %86, %99 : vector<1x1xf32>
      %c0_49 = arith.constant 0 : index
      %c0_50 = arith.constant 0 : index
      %101 = vector.load %arg10[%c0_49, %c0_50] : memref<1x1xf32, #tpu.memory_space<vmem>>, vector<1x1xf32>
      tpu.vector_store %arg10[%c0_49, %c0_50], %100 {strides = array<i32>} : memref<1x1xf32, #tpu.memory_space<vmem>>, vector<1x1xf32>,
    } else {
    }
    %c1_i32_39 = arith.constant 1 : i32
    %81 = arith.cmpi eq, %arg0, %c1_i32_39 : i32
    %c1_i32_40 = arith.constant 1 : i32
    %82 = arith.cmpi eq, %arg1, %c1_i32_40 : i32
    %83 = arith.andi %81, %82 : i1
    %84 = arith.extui %83 : i1 to i32
    %c0_i32_41 = arith.constant 0 : i32
    %85 = arith.cmpi ne, %84, %c0_i32_41 : i32
    scf.if %85 {
      %c0_42 = arith.constant 0 : index
      %c0_43 = arith.constant 0 : index
      %86 = vector.load %arg10[%c0_42, %c0_43] : memref<1x1xf32, #tpu.memory_space<vmem>>, vector<1x1xf32>
      %cst_44 = arith.constant 3.125000e-02 : f32
      %87 = vector.broadcast %cst_44 : f32 to vector<1x1xf32>
      %88 = arith.mulf %86, %87 : vector<1x1xf32>
      %c0_45 = arith.constant 0 : index
      %c0_46 = arith.constant 0 : index
      %89 = vector.load %arg5[%c0_45, %c0_46] : memref<1x1xf32, #tpu.memory_space<vmem>>, vector<1x1xf32>
      tpu.vector_store %arg5[%c0_45, %c0_46], %88 {strides = array<i32>} : memref<1x1xf32, #tpu.memory_space<vmem>>, vector<1x1xf32>,
    } else {
    }
    return
  }
  func.func @transform_0(%arg0: i32, %arg1: i32) -> (i32, i32) {
    %c0_i32 = arith.constant 0 : i32
    %c0_i32_0 = arith.constant 0 : i32
    %c0_i32_1 = arith.constant 0 : i32
    return %c0_i32, %c0_i32_0 : i32, i32
  }
  func.func @transform_1(%arg0: i32, %arg1: i32) -> (i32, i32) {
    %c0_i32 = arith.constant 0 : i32
    %c0_i32_0 = arith.constant 0 : i32
    return %arg0, %c0_i32 : i32, i32
  }
  func.func @transform_2(%arg0: i32, %arg1: i32) -> (i32, i32) {
    %c0_i32 = arith.constant 0 : i32
    %c0_i32_0 = arith.constant 0 : i32
    return %arg1, %c0_i32 : i32, i32
  }
  func.func @transform_3(%arg0: i32, %arg1: i32) -> (i32, i32) {
    %c0_i32 = arith.constant 0 : i32
    %c0_i32_0 = arith.constant 0 : i32
    %c0_i32_1 = arith.constant 0 : i32
    return %c0_i32, %c0_i32_0 : i32, i32
  }
}

</mosaic_0001>

<bundles_post_ra>
// kernel: tpu_custom_call.1
= control target key start
LH: loop header
LB: loop body
LE: loop exit
PB: predicated region body
PF: predicated region fallthrough
CT: control target
= control target key end

     0   :  { %s1446_s0 = inlined_call_operand.<no memory space> [shape: f32[1,1], index: 0, kind: input, shape index: {}]   ;;  %s1447_s1 = inlined_call_operand.hbm [shape: f32[32,64], index: 1, kind: input, shape index: {}]   ;;  %s1448_s2 = inlined_call_operand.hbm [shape: f32[32,64], index: 2, kind: input, shape index: {}]   ;;  %s1449_s3 = inlined_call_operand.hbm [shape: f32[1,1], index: 3, kind: output, shape index: {}]  }
   0x1   :  { %8 = sst [smem:[#allocation7]] %s1446_s0 }
   0x2   :  { %9 = vsyncpa [#allocation9], 0 }
   0x3   :  { %11 = vsyncpa [#allocation9 + $0x1], 0 }
   0x4   :  { %12 = vsyncpa [#allocation12], 0 }
   0x5   :  { %14 = vsyncpa [#allocation12 + $0x1], 0 }
   0x6   :  { %15 = vsyncpa [#allocation10], 0  ;;  %s1065_s14 = smov 0   ;;  %s1067_s15 = smov 0  }
   0x7   :  { %s1069_s16 = smov 0   ;;  %s1071_s17 = smov 0  }
   0x8   :  { %s1073_s18 = smov 0   ;;  %s1075_s19 = smov 0  }
   0x9   :  { %s1077_s20 = smov 0   ;;  %s1079_s0 = smov 0  }
   0xa   :  { %s1081_s21 = smov 0   ;;  %s1083_s22 = smov 0  }
   0xb   :  { %s1085_s23 = smov 0  }
   0xc LB: > { %s1453_s24 = sadd.s32 4294967295, %s1029_s23   ;;  %s33_s25 = sadd.s32 1, %s1025_s22  ;;  %s1029_s23 = sphi %s1085_s23, %s21_s23   ;;  %s1025_s22 = sphi %s1083_s22, %s1482_s22   ;;  %s1021_s21 = sphi %s1081_s21, %s1481_s21   ;;  %s1017_s0 = sphi %s1079_s0, %s1480_s0   ;;  %s1013_s20 = sphi %s1077_s20, %s1479_s20   ;;  %s1009_s19 = sphi %s1075_s19, %s1478_s19   ;;  %s1005_s18 = sphi %s1073_s18, %s1477_s18   ;;  %s1001_s17 = sphi %s1071_s17, %s1476_s17   ;;  %s997_s16 = sphi %s1069_s16, %s1475_s16   ;;  %s993_s15 = sphi %s1067_s15, %s1474_s15   ;;  %s989_s14 = sphi %s1065_s14, %s1473_s14  }
   0xd   : > { %p68_p0 = scmp.ne.s32.totalorder %s1009_s19, %s1005_s18  ;;  %p1451_p1 = scmp.eq.s32.totalorder %s1029_s23, 0 }
   0xe   : > { %p74_p2 = scmp.ne.s32.totalorder %s1005_s18, %s1001_s17  ;;  %p1126_p3 = scmp.eq.s32.totalorder %s1453_s24, 0 }
   0xf   : > { %p70_p4 = por %p1451_p1, %p68_p0  ;;  %p1450_p5 = scmp.lt.s32.totalorder %s1029_s23, 4 }
  0x10   : > { %p1135_p6 = por %p1126_p3, %p74_p2  ;;  %s148_s28 = sand.u32 1, %s1009_s19  }
  0x11   : > { %s653_s29 = sshll.u32 %s148_s28, 4  ;;  %s675_s30 = sshll.u32 %s1025_s22, 8 }
  0x12   : > { %s1458_s27 = scalar_select %p1135_p6, 1, 0 }
  0x13   : > { %s1144_s6 = scalar_lea.hbm %s1447_s1, %s675_s30  ;;  %s152_s7 = scalar_lea.vmem [#allocation8], %s653_s29 }
  0x14   : > { %s159_s8 = sshll.u32 %s152_s7, 4  ;;  %p1150_p7 = pnand %p1450_p5, %p70_p4  ;;  %s1146_s8 = int_to_ptr.vmem [resolvable:$true] %s159_s8 }
  0x15   : > { %s1155_s10 = scalar_lea.sflag [#allocation9], %s148_s28  ;;  %s845_s11 = scalar_lea.hbm %s1144_s6, 256 }
  0x16   : > { %p846_p9 = scmp.ne.s32.totalorder %s1144_s6, %s845_s11  ;;  %p847_p10 = pneg %p1150_p7 }
  0x17   : > { %s850_s17 = scalar_lea.hbm %s1447_s1, 512  ;;  %p851_p13 = scmp.lt.u32.totalorder %s1144_s6, %s1447_s1 }
  0x18   : > { %p848_p11 = pnand %p847_p10, %p846_p9  ;;  %p852_p0 = scmp.lt.u32.totalorder %s850_s17, %s845_s11 }
  0x19   : > { %p854_p4 = scmp.lt.u32.totalorder %s845_s11, %s1144_s6 }
  0x1a   : > { %p849_p12 = pneg %p848_p11  ;;  %p853_p2 = por %p852_p0, %p851_p13 }
  0x1c   : > { %p855_p5 = por %p854_p4, %p853_p2 }
  0x1e   : > { %p856_p1 = pnand %p855_p5, %p849_p12 }
  0x20   : > { %859 = shalt.err (!%p856_p1)
}
  0x21   : > { %s860_s28 = scalar_lea.vmem %s1146_s8, 256  ;;  %s1031_s4 = smov [#allocation8]  }
  0x22   : > { %p861_p9 = scmp.ne.s32.totalorder %s1146_s8, %s860_s28  ;;  %s865_s5 = sshll.u32 %s1031_s4, 4  ;;  %s866_s5 = int_to_ptr.vmem [resolvable:$false] %s865_s5 }
  0x23   : > { %s867_s7 = scalar_lea.vmem %s866_s5, 512  ;;  %p868_p6 = scmp.lt.s32.totalorder %s1146_s8, %s866_s5 }
  0x24   : > { %p863_p11 = pnand %p861_p9, %p847_p10  ;;  %p869_p13 = scmp.lt.s32.totalorder %s867_s7, %s860_s28 }
  0x26   : > { %p864_p8 = pneg %p863_p11  ;;  %p870_p0 = por %p869_p13, %p868_p6 }
  0x28   : > { %p871_p2 = pnand %p870_p0, %p864_p8 }
  0x2a   : > { %874 = shalt.err (!%p871_p2)
}
  0x2b   : > { %s1454_s11 = smov 128   ;;  %s1455_s12 = smov 8  }
  0x2c   : > { %711 = dma.hbm_to_vmem [thread:$0]  (!%p1150_p7), %s1144_s6, 256, %s1146_s8, %s1155_s10, %s1454_s11, %s1454_s11, %s1455_s12  }
  0x2d   : > { %p188_p1 = scmp.lt.s32.totalorder %s1029_s23, 5  ;;  %p1460_p5 = scmp.ge.s32.totalorder %s1029_s23, 1 }
  0x2e   : > { %s61_s17 = sadd.s32 1, %s1009_s19  ;;  %s30_s29 = sadd.s32 1, %s1021_s21 }
  0x2f   : > { %p1189_p6 = pnand %p1460_p5, %p188_p1  ;;  %p31_p8 = scmp.ge.s32.totalorder %s30_s29, 2 }
  0x30   : > { %s87_s30 = sadd.s32 1, %s997_s16  ;;  %p94_p10 = scmp.ne.s32.totalorder %s997_s16, %s993_s15 }
  0x31   : > { %p100_p12 = scmp.ne.s32.totalorder %s993_s15, %s989_s14  ;;  %s1484_s29 = smov (%p31_p8, %s30_s29), 0 }
  0x32   : > { %s1486_s25 = smov (!%p31_p8, %s33_s25), %s1025_s22  ;;  %s84_s6 = ssub.s32 %s1021_s21, %s1484_s29 }
  0x33   : > { %s169_s8 = sand.u32 1, %s997_s16   ;;  %p35_p7 = scmp.ge.s32.totalorder %s1486_s25, 2 }
  0x34   : > { %p85_p4 = scmp.eq.s32.totalorder %s84_s6, 0  ;;  %p1462_p9 = scmp.eq.s32.totalorder %s1029_s23, 0 }
  0x35   : > { %p1216_p13 = por %p100_p12, %p1126_p3  ;;  %s1488_s25 = smov (%p35_p7, %s1486_s25), 0 }
  0x36   : > { %p1210_p11 = por %p94_p10, %p1462_p9  ;;  %s58_s28 = ssub.s32 %s1025_s22, %s1488_s25 }
  0x37   : > { %s1464_s14 = scalar_select %p1216_p13, 1, 0 }
  0x38   : > { %s1223_s10 = scalar_select %p85_p4, %s997_s16, %s87_s30  }
  0x39   : > { %s656_s4 = sshll.u32 %s169_s8, 4  ;;  %p59_p0 = scmp.eq.s32.totalorder %s58_s28, 0 }
  0x3a   : > { %s676_s5 = sshll.u32 %s1021_s21, 8  ;;  %s173_s7 = scalar_lea.vmem [#allocation11], %s656_s4 }
  0x3b   : > { %s180_s6 = sshll.u32 %s173_s7, 4  ;;  %s1234_s12 = scalar_lea.hbm %s1448_s2, %s676_s5  ;;  %s1236_s6 = int_to_ptr.vmem [resolvable:$true] %s180_s6 }
  0x3c   : > { %s1229_s24 = scalar_select %p59_p0, %s1009_s19, %s61_s17  }
  0x3d   : > { %p1465_p3 = scmp.lt.s32.totalorder %s1029_s23, 4  ;;  %s1246_s17 = scalar_lea.sflag [#allocation12], %s169_s8 }
  0x3e   : > { %s875_s28 = scalar_lea.hbm %s1234_s12, 256  ;;  %s880_s9 = scalar_lea.hbm %s1448_s2, 512 }
  0x3f   : > { %p1242_p2 = pnand %p1465_p3, %p1210_p11  ;;  %p876_p1 = scmp.ne.s32.totalorder %s1234_s12, %s875_s28 }
  0x40   : > { %p881_p12 = scmp.lt.u32.totalorder %s1234_s12, %s1448_s2  ;;  %p882_p7 = scmp.lt.u32.totalorder %s880_s9, %s875_s28 }
  0x41   : > { %p877_p5 = pneg %p1242_p2  ;;  %p884_p9 = scmp.lt.u32.totalorder %s875_s28, %s1234_s12 }
  0x42   : > { %p883_p4 = por %p882_p7, %p881_p12 }
  0x43   : > { %p878_p8 = pnand %p877_p5, %p876_p1 }
  0x44   : > { %p885_p11 = por %p884_p9, %p883_p4 }
  0x45   : > { %p879_p10 = pneg %p878_p8 }
  0x47   : > { %p886_p0 = pnand %p885_p11, %p879_p10 }
  0x49   : > { %889 = shalt.err (!%p886_p0)
}
  0x4a   : > { %s890_s8 = scalar_lea.vmem %s1236_s6, 256  ;;  %s1034_s26 = smov [#allocation11]  }
  0x4b   : > { %p891_p3 = scmp.ne.s32.totalorder %s1236_s6, %s890_s8  ;;  %s895_s11 = sshll.u32 %s1034_s26, 4  ;;  %s896_s11 = int_to_ptr.vmem [resolvable:$false] %s895_s11 }
  0x4c   : > { %s897_s4 = scalar_lea.vmem %s896_s11, 512  ;;  %p898_p13 = scmp.lt.s32.totalorder %s1236_s6, %s896_s11 }
  0x4d   : > { %p893_p1 = pnand %p891_p3, %p877_p5  ;;  %p899_p12 = scmp.lt.s32.totalorder %s897_s4, %s890_s8 }
  0x4f   : > { %p894_p8 = pneg %p893_p1  ;;  %p900_p7 = por %p899_p12, %p898_p13 }
  0x51   : > { %p901_p4 = pnand %p900_p7, %p894_p8 }
  0x53   : > { %904 = shalt.err (!%p901_p4)
}
  0x54   : > { %s1467_s28 = smov 8   ;;  %s1468_s9 = smov 128  }
  0x55   : > { %714 = dma.hbm_to_vmem [thread:$0]  (!%p1242_p2), %s1234_s12, 256, %s1236_s6, %s1246_s17, %s1468_s9, %s1468_s9, %s1467_s28  }
  0x56   : > { %192 = sbr.rel (%p1189_p6) target bundleno = 1510 (0x5e6), region = 32  ;;  %s194_s5 = sand.u32 (!%p1189_p6), 1, %s1005_s18  }
  0x57   : > { %s1280_s7 = sshll.u32 (!%p1189_p6), %s194_s5, 4  ;;  %s195_s8 = scalar_lea.sflag (!%p1189_p6), [#allocation9], %s194_s5 }
  0x58   : > { %s198_s26 = scalar_lea.vmem (!%p1189_p6), [#allocation8], %s1280_s7  ;;  %p1469_p13 = scmp.ne.s32.totalorder (!%p1189_p6), %s1458_s27, 0 }
  0x5d   : > { %976 = dma.done.wait (%p1469_p13), %s195_s8, 256  }
  0x5e   : > { %978 = vsyncadd (%p1469_p13), %s195_s8, 4294967040  ;;  %s203_s30 = sand.u32 1, %s993_s15   ;;  %p1470_p6 = scmp.ne.s32.totalorder %s1464_s14, 0 }
  0x5f   : > { %s1288_s12 = sshll.u32 %s203_s30, 4  ;;  %s204_s13 = scalar_lea.sflag [#allocation12], %s203_s30 }
  0x60   : > { %s207_s6 = scalar_lea.vmem [#allocation11], %s1288_s12 }
  0x61   : > { %980 = dma.done.wait (%p1470_p6), %s204_s13, 256  }
  0x62   : > { %982 = vsyncadd (%p1470_p6), %s204_s13, 4294967040  ;;  %p233_p2 = scmp.eq.s32.totalorder %s1017_s0, 0  ;;  %p234_p5 = scmp.eq.s32.totalorder %s1013_s20, 0 }
  0x63   : > { %s1297_s17 = sld [smem:[#allocation7]] }
  0x64   : > { %p235_p10 = pnand %p234_p5, %p233_p2 }
  0x65   : > { %vm239_vm0 = vcmask (!%p235_p10), 0   ;;  %v1035_v0 = vmov (!%p235_p10), 0.0  }
  0x66   : > { %238 = sbr.rel (%p235_p10) target bundleno = 109 (0x6d), region = 44  ;;  %240 = vst.msk [vmem:[#allocation6] sm:$0x1] (!%p235_p10), %vm239_vm0, %v1035_v0 }
  0x6d PF: > { %p662_p9 = scmp.ne.s32.totalorder %s1013_s20, 0 }
  0x6e   : > { %vm244_vm1 = vcmask (!%p662_p9), 7168   ;;  %v1036_v1 = vmov (!%p662_p9), -inf   ;;  %v1037_v2 = vmov (!%p662_p9), 0.0  }
  0x6f   : > { %243 = sbr.rel (%p662_p9) target bundleno = 118 (0x76), region = 48  ;;  %245 = vst.msk [vmem:[#allocation2] sm:$0xff] (!%p662_p9), %vm244_vm1, %v1036_v1  ;;  %246 = vst.msk [vmem:[#allocation2 + $0x8] sm:$0xff] (!%p662_p9), %vm244_vm1, %v1036_v1 }
  0x70   : > { %247 = vst.msk [vmem:[#allocation3] sm:$0xff] (!%p662_p9), %vm244_vm1, %v1037_v2  ;;  %248 = vst.msk [vmem:[#allocation3 + $0x8] sm:$0xff] (!%p662_p9), %vm244_vm1, %v1037_v2 }
  0x76 PF: > { %p663_p11 = scmp.ne.s32.totalorder %s1017_s0, 0 }
  0x77   : > { %vm253_vm2 = vcmask (!%p663_p11), 122880   ;;  %s252_s27 = scalar_lea.vmem (!%p663_p11), [#allocation4], %s1013_s20  ;;  %v1038_v3 = vmov (!%p663_p11), -inf   ;;  %s255_s14 = scalar_lea.vmem (!%p663_p11), [#allocation5], %s1013_s20  ;;  %v1039_v4 = vmov (!%p663_p11), 0.0  }
  0x78   : > { %251 = sbr.rel (%p663_p11) target bundleno = 127 (0x7f), region = 52  ;;  %254 = vst.msk [vmem:[%s252_s27] sm:$0x1] (!%p663_p11), %vm253_vm2, %v1038_v3  ;;  %256 = vst.msk [vmem:[%s255_s14] sm:$0x1] (!%p663_p11), %vm253_vm2, %v1039_v4 }
  0x7f PF: > { %v259_v5 = vld [vmem:[%s207_s6] sm:$0xff]  ;;  %vm263_vm3 = vcmask 523264   ;;  %v260_v6 = vld [vmem:[%s207_s6 + $0x8] sm:$0xff]  ;;  %v286_v22 = vstv %s1297_s17  ;;  %vm376_vm5 = vcmask 130048   ;;  %v439_v39 = vlaneseq  ;;  %s1341_s11 = scalar_lea.vmem [#allocation4], %s1013_s20  ;;  %s1351_s4 = scalar_lea.vmem [#allocation5], %s1013_s20 }
  0x80   : > { %v257_v7 = vld [vmem:[%s198_s26] sm:$0xff]  ;;  %v274_v8 = vmul.f32 %v259_v5, %v259_v5  ;;  %v275_v9 = vmul.f32 %v260_v6, %v260_v6  ;;  %v258_v11 = vld [vmem:[%s198_s26 + $0x8] sm:$0xff]  ;;  %vm689_vm4 = vmpackc.low %vm263_vm3, %vm263_vm3  ;;  %vm464_vm6 = vcmask 122880   ;;  %v1040_v49 = vmov 0   ;;  %p668_p0 = scmp.ne.s32.totalorder %s1017_s0, %s1013_s20 }
  0x81   : > { %v261_v10 = vmul.f32 %v257_v7, %v257_v7  ;;  %v262_v12 = vmul.f32 %v258_v11, %v258_v11  ;;  %v440_v42 = vshrl.u32 %v439_v39, 7  ;;  %v434_v45 = vld [vmem:[%s1341_s11] sm:$0x1]  ;;  %816 = vset.pattern.permute.xlu1 %v1040_v49  ;;  %815 = vset.pattern.permute.xlu0 %v1040_v49  ;;  %vm421_vm7 = vcmask 7168  }
  0x82   : > { %v276_v13 = vsel %vm263_vm3, %v274_v8, 0.0  ;;  %v279_v15 = vsel %vm263_vm3, %v275_v9, 0.0  ;;  %v436_v3 = vld [vmem:[%s1351_s4] sm:$0x1]  ;;  %v384_v8 = vld [vmem:[#allocation2 + $0x8] sm:$0xff]  ;;  %vm489_vm8 = vcmask (!%p668_p0), 0  }
  0x83   : > { %v264_v14 = vsel %vm263_vm3, %v261_v10, 0.0  ;;  %277 = vadd.xlane.f32.xlu0 %v276_v13  ;;  %v267_v16 = vsel %vm263_vm3, %v262_v12, 0.0  ;;  %v441_v46 = vsub.s32 0, %v440_v42  ;;  %v383_v9 = vld [vmem:[#allocation2] sm:$0xff] }
  0x84   : > { %265 = vadd.xlane.f32.xlu1 %v264_v14 }
  0x87   : > { %280 = vadd.xlane.f32.xlu0 %v279_v15 }
  0x88   : > { %268 = vadd.xlane.f32.xlu1 %v267_v16 }
 0x110   : > { %v278_v17 = vpop.xlane.xlu0 %277 }
 0x111   : > { %v266_v18 = vpop.xlane.xlu1 %265 }
 0x112   : > { %817 = vrsqrt.f32 %v266_v18 }
 0x113   : > { %819 = vrsqrt.f32 %v278_v17 }
 0x114   : > { %v281_v19 = vpop.xlane.xlu0 %280 }
 0x115   : > { %v269_v20 = vpop.xlane.xlu1 %268  ;;  %821 = vrsqrt.f32 %v281_v19 }
 0x116   : > { %823 = vrsqrt.f32 %v269_v20 }
 0x11c   : > { %v818_v21 = vpop.eup %817 }
 0x11d   : > { %v820_v23 = vpop.eup %819  ;;  %v272_v24 = vmul.f32 %v818_v21, %v257_v7 }
 0x11e   : > { %v1318_v27 = vmul.f32 %v820_v23, %v259_v5 }
 0x11f   : > { %v822_v25 = vpop.eup %821  ;;  %v1316_v26 = vmul.f32 %v286_v22, %v272_v24 }
 0x120   : > { %v1320_v28 = vmul.f32 %v822_v25, %v260_v6  ;;  %v824_v29 = vpop.eup %823 }
 0x121   : > { %685 = vmatprep.mubr.msk.f32.mxu0 %vm263_vm3, %v1316_v26  ;;  %v273_v31 = vmul.f32 %v824_v29, %v258_v11  ;;  %v471_v42 = vmul.f32 (!%p668_p0), %v1316_v26, %v1318_v27  ;;  %v486_v26 = vld [vmem:[#allocation6] sm:$0x1] (!%p668_p0) }
 0x122   : > { %v688_v30 = vpack.c.bf16 %v1320_v28, %v1318_v27 }
 0x123   : > { %v1328_v32 = vmul.f32 %v286_v22, %v273_v31 }
 0x124   : > { %690 = vmatprep.subr.msk.bf16.mxu0 %vm689_vm4, %v688_v30 }
 0x125   : > { %693 = vmatpush3.bf16.xpose.msk.msra.mxu0 %vm689_vm4, %v688_v30 }
 0x12c   : > { %686 = vmatmul.mubr.msk.f32.vlgmr.msra.gmra.mrb[0].mxu0 %vm263_vm3, %v1328_v32 }
 0x1ff   : > { %v1332_v33 = vpop.f32.mrb[0].mxu0 }
 0x200   : > { %v1334_v34 = vpop.f32.mrb[1].mxu0  ;;  %v380_v35 = vsel %vm376_vm5, %v1332_v33, -inf }
 0x201   : > { %381 = vmax.xlane.f32.xlu1 %v380_v35  ;;  %v377_v36 = vsel %vm376_vm5, %v1334_v34, -inf }
 0x202   : > { %378 = vmax.xlane.f32.xlu0 %v377_v36  ;;  %v426_v37 = vmax.f32 %v377_v36, %v380_v35 }
 0x204   : > { %v427_v38 = vrot.slane %v426_v37, 4 }
 0x206   : > { %v428_v40 = vmax.f32 %v426_v37, %v427_v38 }
 0x208   : > { %v429_v41 = vrot.slane %v428_v40, 2 }
 0x20a   : > { %v430_v43 = vmax.f32 %v428_v40, %v429_v41 }
 0x20c   : > { %v431_v44 = vrot.slane %v430_v43, 1 }
 0x20e   : > { %v432_v47 = vmax.f32 %v430_v43, %v431_v44  ;;  %v472_v43 = vmul.f32 (!%p668_p0), %v1328_v32, %v1320_v28  ;;  %v473_v44 = vsel (!%p668_p0), %vm263_vm3, %v471_v42, 0.0 }
 0x210   : > { %v437_v48 = vmax.f32 %v434_v45, %v432_v47 }
 0x212   : > { %v442_v50 = vrot.slane %v437_v48, %v441_v46  ;;  %466 = vst.msk [vmem:[%s1341_s11] sm:$0x1] %vm464_vm6, %v437_v48  ;;  %v459_v55 = vsub.f32 %v434_v45, %v437_v48  ;;  %v474_v45 = vsel (!%p668_p0), %vm263_vm3, %v472_v43, 0.0 }
 0x213   : > { %v475_v46 = vadd.f32 (!%p668_p0), %v474_v45, %v473_v44 }
 0x214   : > { %v444_v51 = vsub.f32 %v1334_v34, %v442_v50  ;;  %v445_v52 = vsub.f32 %v1332_v33, %v442_v50  ;;  %v460_v56 = vmul.f32 1.442695, %v459_v55 }
 0x216   : > { %v446_v53 = vmul.f32 1.442695, %v444_v51  ;;  %v448_v54 = vmul.f32 1.442695, %v445_v52 }
 0x218   : > { %825 = vpow2.f32 %v446_v53 }
 0x219   : > { %827 = vpow2.f32 %v448_v54 }
 0x21a   : > { %829 = vpow2.f32 %v460_v56 }
 0x222   : > { %v826_v57 = vpop.eup %825 }
 0x223   : > { %v828_v58 = vpop.eup %827  ;;  %v450_v59 = vsel %vm376_vm5, %v826_v57, 0.0 }
 0x224   : > { %v451_v60 = vsel %vm376_vm5, %v828_v58, 0.0  ;;  %v830_v2 = vpop.eup %829 }
 0x225   : > { %v452_v61 = vadd.f32 %v451_v60, %v450_v59  ;;  %v462_v6 = vmul.f32 %v830_v2, %v436_v3 }
 0x227   : > { %v453_v62 = vrot.slane %v452_v61, 4 }
 0x229   : > { %v454_v63 = vadd.f32 %v453_v62, %v452_v61 }
 0x22b   : > { %v455_v0 = vrot.slane %v454_v63, 2 }
 0x22d   : > { %v456_v1 = vadd.f32 %v455_v0, %v454_v63 }
 0x22f   : > { %v457_v4 = vrot.slane %v456_v1, 1 }
 0x231   : > { %v458_v5 = vadd.f32 %v457_v4, %v456_v1 }
 0x233   : > { %v463_v7 = vadd.f32 %v462_v6, %v458_v5 }
 0x235   : > { %465 = vst.msk [vmem:[%s1351_s4] sm:$0x1] %vm464_vm6, %v463_v7 }
 0x28e   : > { %v382_v10 = vpop.xlane.xlu1 %381 }
 0x28f   : > { %v386_v11 = vmax.f32 %v384_v8, %v382_v10  ;;  %v379_v12 = vpop.xlane.xlu0 %378 }
 0x290   : > { %v385_v13 = vmax.f32 %v383_v9, %v379_v12 }
 0x291   : > { %v406_v14 = vsub.f32 %v384_v8, %v386_v11  ;;  %425 = vst.msk [vmem:[#allocation2 + $0x8] sm:$0xff] %vm421_vm7, %v386_v11  ;;  %394 = vperm.xlu1 %816, %v386_v11  }
 0x292   : > { %v405_v15 = vsub.f32 %v383_v9, %v385_v13  ;;  %424 = vst.msk [vmem:[#allocation2] sm:$0xff] %vm421_vm7, %v385_v13  ;;  %389 = vperm.xlu0 %815, %v385_v13  }
 0x293   : > { %v409_v29 = vmul.f32 1.442695, %v406_v14 }
 0x294   : > { %v407_v30 = vmul.f32 1.442695, %v405_v15 }
 0x310   : > { %v395_v16 = vpop.permute.xlu1 %394 }
 0x311   : > { %v398_v17 = vsub.f32 %v1332_v33, %v395_v16  ;;  %v390_v18 = vpop.permute.xlu0 %389  ;;  %v404_v33 = vld [vmem:[#allocation3 + $0x8] sm:$0xff] }
 0x312   : > { %v397_v19 = vsub.f32 %v1334_v34, %v390_v18  ;;  %v403_v34 = vld [vmem:[#allocation3] sm:$0xff] }
 0x313   : > { %v401_v20 = vmul.f32 1.442695, %v398_v17 }
 0x314   : > { %v399_v21 = vmul.f32 1.442695, %v397_v19 }
 0x315   : > { %831 = vpow2.f32 %v401_v20 }
 0x316   : > { %833 = vpow2.f32 %v399_v21 }
 0x317   : > { %835 = vpow2.f32 %v409_v29 }
 0x318   : > { %837 = vpow2.f32 %v407_v30 }
 0x31f   : > { %v832_v22 = vpop.eup %831 }
 0x320   : > { %v834_v23 = vpop.eup %833  ;;  %v416_v24 = vsel %vm376_vm5, %v832_v22, 0.0 }
 0x321   : > { %417 = vadd.xlane.f32.xlu0 %v416_v24  ;;  %v413_v25 = vsel %vm376_vm5, %v834_v23, 0.0  ;;  %v836_v31 = vpop.eup %835 }
 0x322   : > { %414 = vadd.xlane.f32.xlu1 %v413_v25  ;;  %v838_v35 = vpop.eup %837  ;;  %v412_v36 = vmul.f32 %v836_v31, %v404_v33 }
 0x323   : > { %v411_v38 = vmul.f32 %v838_v35, %v403_v34 }
 0x325   : > { %476 = vadd.xlane.f32.xlu0 (!%p668_p0), %v475_v46 }
 0x3ac   : > { %470 = sbr.rel (%p668_p0) target bundleno = 1015 (0x3f7), region = 56 }
 0x3ae   : > { %v418_v37 = vpop.xlane.xlu0 %417 }
 0x3af   : > { %v420_v39 = vadd.f32 %v418_v37, %v412_v36  ;;  %v415_v40 = vpop.xlane.xlu1 %414 }
 0x3b0   : > { %v419_v41 = vadd.f32 %v415_v40, %v411_v38 }
 0x3b1   : > { %423 = vst.msk [vmem:[#allocation3 + $0x8] sm:$0xff] %vm421_vm7, %v420_v39 }
 0x3b2   : > { %422 = vst.msk [vmem:[#allocation3] sm:$0xff] %vm421_vm7, %v419_v41  ;;  %v477_v47 = vpop.xlane.xlu0 (!%p668_p0), %476 }
 0x3b3   : > { %v478_v48 = vrot.slane %v477_v47, 4 }
 0x3b5   : > { %v479_v49 = vadd.f32 %v478_v48, %v477_v47 }
 0x3b7   : > { %v480_v50 = vrot.slane %v479_v49, 2 }
 0x3b9   : > { %v481_v51 = vadd.f32 %v480_v50, %v479_v49 }
 0x3bb   : > { %v482_v52 = vrot.slane %v481_v51, 1 }
 0x3bd   : > { %v483_v53 = vadd.f32 %v482_v52, %v481_v51 }
 0x3bf   : > { %694 = vpush %v483_v53 }
 0x3f0   : > { %s695_s28 = spop %694 }
 0x3f1   : > { %v485_v54 = vstv %s695_s28 }
 0x3f2   : > { %v487_v27 = vmul.f32 2.0, %v485_v54 }
 0x3f4   : > { %v488_v28 = vsub.f32 %v486_v26, %v487_v27 }
 0x3f6   : > { %490 = vst.msk [vmem:[#allocation6] sm:$0x1] %vm489_vm8, %v488_v28 }
 0x3f7 PF: > { %p491_p3 = scmp.eq.s32.totalorder %s1013_s20, 1  ;;  %p669_p1 = scmp.ne.s32.totalorder %s1013_s20, 1 }
 0x3f8   : > { %v496_v57 = vld [vmem:[#allocation2] sm:$0xff] (!%p669_p1)  ;;  %v497_v59 = vld [vmem:[#allocation2 + $0x8] sm:$0xff] (!%p669_p1)  ;;  %vm520_vm9 = vcmask (!%p669_p1), 0  }
 0x3f9   : > { %494 = sbr.rel (%p669_p1) target bundleno = 1249 (0x4e1), region = 60 }
 0x3fc   : > { %v499_v55 = vld [vmem:[#allocation3 + $0x8] sm:$0xff] (!%p669_p1) }
 0x3fd   : > { %v498_v32 = vld [vmem:[#allocation3] sm:$0xff] (!%p669_p1)  ;;  %v495_v10 = vld [vmem:[#allocation6] sm:$0x1] (!%p669_p1) }
 0x3fe   : > { %839 = vlog2.f32 (!%p669_p1), %v498_v32 }
 0x3ff   : > { %841 = vlog2.f32 (!%p669_p1), %v499_v55 }
 0x408   : > { %v840_v56 = vpop.eup %839 }
 0x409   : > { %v842_v58 = vpop.eup %841  ;;  %v501_v60 = vmul.f32 0.6931472, %v840_v56 }
 0x40a   : > { %v503_v61 = vmul.f32 0.6931472, %v842_v58 }
 0x40b   : > { %v504_v62 = vadd.f32 %v501_v60, %v496_v57 }
 0x40c   : > { %v505_v63 = vadd.f32 %v503_v61, %v497_v59 }
 0x40d   : > { %v506_v0 = vsel %vm421_vm7, %v504_v62, 0.0 }
 0x40e   : > { %v507_v1 = vsel %vm421_vm7, %v505_v63, 0.0 }
 0x40f   : > { %v508_v2 = vadd.f32 %v507_v1, %v506_v0 }
 0x411   : > { %509 = vadd.xlane.f32.xlu0 %v508_v2 }
 0x49e   : > { %v510_v3 = vpop.xlane.xlu0 %509 }
 0x49f   : > { %v511_v4 = vrot.slane %v510_v3, 4 }
 0x4a1   : > { %v512_v5 = vadd.f32 %v511_v4, %v510_v3 }
 0x4a3   : > { %v513_v6 = vrot.slane %v512_v5, 2 }
 0x4a5   : > { %v514_v7 = vadd.f32 %v513_v6, %v512_v5 }
 0x4a7   : > { %v515_v8 = vrot.slane %v514_v7, 1 }
 0x4a9   : > { %v516_v9 = vadd.f32 %v515_v8, %v514_v7 }
 0x4ab   : > { %696 = vpush %v516_v9 }
 0x4dc   : > { %s697_s9 = spop %696 }
 0x4dd   : > { %v518_v11 = vstv %s697_s9 }
 0x4de   : > { %v519_v12 = vadd.f32 %v518_v11, %v495_v10 }
 0x4e0   : > { %521 = vst.msk [vmem:[#allocation6] sm:$0x1] %vm520_vm9, %v519_v12 }
 0x4e1 PF: > { %p522_p8 = scmp.eq.s32.totalorder %s1017_s0, 1  ;;  %p670_p12 = scmp.ne.s32.totalorder %s1017_s0, 1 }
 0x4e2   : > { %v528_v13 = vld [vmem:[%s1351_s4] sm:$0x1] (!%p670_p12)  ;;  %vm544_vm10 = vcmask (!%p670_p12), 0  }
 0x4e3   : > { %525 = sbr.rel (%p670_p12) target bundleno = 1475 (0x5c3), region = 64  ;;  %843 = vlog2.f32 (!%p670_p12), %v528_v13  ;;  %v527_v15 = vld [vmem:[%s1341_s11] sm:$0x1] (!%p670_p12) }
 0x4e7   : > { %v526_v29 = vld [vmem:[#allocation6] sm:$0x1] (!%p670_p12) }
 0x4ed   : > { %v844_v14 = vpop.eup %843 }
 0x4ee   : > { %v530_v16 = vmul.f32 0.6931472, %v844_v14 }
 0x4f0   : > { %v531_v17 = vadd.f32 %v530_v16, %v527_v15 }
 0x4f2   : > { %v532_v18 = vsel %vm464_vm6, %v531_v17, 0.0 }
 0x4f3   : > { %533 = vadd.xlane.f32.xlu0 %v532_v18 }
 0x580   : > { %v534_v19 = vpop.xlane.xlu0 %533 }
 0x581   : > { %v535_v20 = vrot.slane %v534_v19, 4 }
 0x583   : > { %v536_v21 = vadd.f32 %v535_v20, %v534_v19 }
 0x585   : > { %v537_v22 = vrot.slane %v536_v21, 2 }
 0x587   : > { %v538_v23 = vadd.f32 %v537_v22, %v536_v21 }
 0x589   : > { %v539_v24 = vrot.slane %v538_v23, 1 }
 0x58b   : > { %v540_v25 = vadd.f32 %v539_v24, %v538_v23 }
 0x58d   : > { %698 = vpush %v540_v25 }
 0x5be   : > { %s699_s5 = spop %698 }
 0x5bf   : > { %v542_v30 = vstv %s699_s5 }
 0x5c0   : > { %v543_v31 = vadd.f32 %v542_v30, %v526_v29 }
 0x5c2   : > { %545 = vst.msk [vmem:[#allocation6] sm:$0x1] %vm544_vm10, %v543_v31 }
 0x5c3 PF: > { %p546_p7 = pnand %p522_p8, %p491_p3 }
 0x5c4   : > { %vm552_vm11 = vcmask (!%p546_p7), 0  }
 0x5c5   : > { %549 = sbr.rel (%p546_p7) target bundleno = 1485 (0x5cd), region = 68 }
 0x5c9   : > { %v550_v33 = vld [vmem:[#allocation6] sm:$0x1] (!%p546_p7) }
 0x5ca   : > { %v551_v35 = vmul.f32 (!%p546_p7), 0.03125, %v550_v33 }
 0x5cc   : > { %553 = vst.msk [vmem:[#allocation13] sm:$0x1] %vm552_vm11, %v551_v35 }
 0x5cd PF: > { %s1471_s7 = sadd.s32 4294967295, %s1029_s23   ;;  %s1041_s26 = smov [#allocation13]  }
 0x5ce   : > { %p1387_p4 = scmp.eq.s32.totalorder %s1471_s7, 3  ;;  %s561_s30 = sshll.u32 %s1041_s26, 4  ;;  %s562_s30 = int_to_ptr.vmem [resolvable:$true] %s561_s30 }
 0x5cf   : > { %s905_s20 = scalar_lea.vmem %s562_s30, 16  ;;  %s911_s0 = scalar_lea.vmem %s562_s30, 32 }
 0x5d0   : > { %p906_p13 = scmp.ne.s32.totalorder %s562_s30, %s905_s20  ;;  %p912_p5 = scmp.lt.s32.totalorder %s562_s30, %s562_s30 }
 0x5d1   : > { %p913_p10 = scmp.lt.s32.totalorder %s911_s0, %s905_s20 }
 0x5d2   : > { %p907_p6 = pnand %p906_p13, %p1387_p4 }
 0x5d3   : > { %p914_p9 = por %p913_p10, %p912_p5 }
 0x5d4   : > { %p908_p2 = pneg %p907_p6 }
 0x5d6   : > { %p915_p11 = pnand %p914_p9, %p908_p2 }
 0x5d8   : > { %918 = shalt.err (!%p915_p11)
}
 0x5d9   : > { %s919_s6 = scalar_lea.hbm %s1449_s3, 16 }
 0x5da   : > { %p920_p0 = scmp.ne.s32.totalorder %s1449_s3, %s919_s6  ;;  %p925_p8 = scmp.lt.u32.totalorder %s919_s6, %s1449_s3 }
 0x5dc   : > { %p921_p3 = pnand %p920_p0, %p1387_p4 }
 0x5de   : > { %p922_p1 = pneg %p921_p3 }
 0x5e0   : > { %p927_p12 = pnand %p925_p8, %p922_p1 }
 0x5e2   : > { %930 = shalt.err (!%p927_p12)
}
 0x5e3   : > { %705 = dma.vmem_to_hbm [thread:$0]  (%p1387_p4), %s562_s30, 16, %s1449_s3, [#allocation10]  }
 0x5e4   : > { %984 = dma.done.wait (%p1387_p4), [#allocation10], 16  }
 0x5e5   : > { %986 = vsyncadd (%p1387_p4), [#allocation10], 4294967280 }
 0x5e6 PF: > { %s21_s23 = sadd.s32 1, %s1029_s23   ;;  %s1473_s14 = smov %s993_s15 }
 0x5e7   : > { %p18_p7 = scmp.ge.s32.totalorder %s21_s23, 6   ;;  %s1474_s15 = smov %s997_s16 }
 0x5e8   : > { %s1475_s16 = smov %s1223_s10  ;;  %s1476_s17 = smov %s1005_s18 }
 0x5e9   : > { %s1477_s18 = smov %s1009_s19  ;;  %s1478_s19 = smov %s1229_s24 }
 0x5ea   : > { %s1479_s20 = smov %s1021_s21  ;;  %s1480_s0 = smov %s1025_s22 }
 0x5eb   : > { %s1481_s21 = smov %s1484_s29  ;;  %s1482_s22 = smov %s1488_s25 }
 0x5ec   :  { %20 = sbr.rel (!%p18_p7) target bundleno = 12 (0xc), region = 114 }
 0x5f3   :  { %574 = vsyncpa [#allocation9], 1 }
 0x5f4   :  { %576 = vsyncpa [#allocation9 + $0x1], 1 }
 0x5f5   :  { %577 = vsyncpa [#allocation12], 1 }
 0x5f6   :  { %579 = vsyncpa [#allocation12 + $0x1], 1 }
 0x5f7   :  { %580 = vsyncpa [#allocation10], 1 }
 0x5f8   :  { %582 = vsyncpa [#allocation10 + $0x1], 1 }

</bundles_post_ra>
